<compile_context>
chip_gen: v7x
topology: tpu7x:2x2x1
jax: 0.10.0
libtpu: 0.0.40
codegen_flags: <defaults>
</compile_context>

<pallas_src>
import functools

import jax
import jax.numpy as jnp
import numpy as np
from jax import lax
from jax.experimental import pallas as pl
from jax.experimental.pallas import tpu as pltpu

# ---- small, module-consistent sizes -----------------------------------------
VOCAB = 64      # vocab_size
EMB   = 32      # configs.embedding_dim == configs.input_size
HID   = 32      # configs.hidden_dim
NCLS  = 8       # num_classes
B     = 2       # batch
T     = 8       # sequence length
LANE  = 128     # TPU lane width (padded linear-head output)
BPAD  = 8       # batch padded to one full sublane tile inside the kernel


def ner_kernel(batch_pad, ids_ref, emb_ref, wih_ref, whh_ref, b_ref,
               wlin_ref, blin_ref, out_ref):
    """Fused embedding-gather + LSTM recurrence + linear head, all in VMEM/vregs.

    ids_ref  : (T*BP, 1)  int32 token ids, time-major rows (row = t*BP + b)
    emb_ref  : (V, D)     embedding table
    wih_ref  : (D, 4H)    input->gates weights (gate order i, f, g, o)
    whh_ref  : (H, 4H)    hidden->gates weights
    b_ref    : (1, 4H)    combined bias (b_ih + b_hh)
    wlin_ref : (H, 128)   linear head weight, zero-padded to lane width
    blin_ref : (1, 128)   linear head bias, zero-padded to lane width
    out_ref  : (T*BP,128) padded logits (single lane-dense store)
    """
    hid = whh_ref.shape[0]
    vocab = emb_ref.shape[0]
    tb = ids_ref.shape[0]
    seq_len = tb // batch_pad

    # ---- (R3) fused embedding gather: one-hot(ids) @ E on the MXU -----------
    ids = ids_ref[...]                                              # (T*BP, 1)
    onehot = (lax.broadcasted_iota(jnp.int32, (tb, vocab), 1) == ids
              ).astype(jnp.float32)                                 # (T*BP, V)
    x = jnp.dot(onehot, emb_ref[...],
                preferred_element_type=jnp.float32)                 # (T*BP, D)
    # dropout(p) at inference (training=None) -> identity.

    # ---- hoisted input projection + bias: one (T*BP, D) @ (D, 4H) matmul ----
    gx = jnp.dot(x, wih_ref[...],
                 preferred_element_type=jnp.float32) + b_ref[...]   # (T*BP,4H)

    # ---- (R1)+(R2) recurrence fully in vregs; only h @ W_hh on the chain ----
    whh = whh_ref[...]                          # load once, RHS reused T times
    h = jnp.zeros((batch_pad, hid), jnp.float32)
    c = jnp.zeros((batch_pad, hid), jnp.float32)
    hs = []
    for t in range(seq_len):                    # static unroll (T is static)
        gates = gx[t * batch_pad:(t + 1) * batch_pad, :] + jnp.dot(
            h, whh, preferred_element_type=jnp.float32)             # (BP, 4H)
        # full-vreg EUP nonlinearities, then static lane slices (i, f, g, o)
        sg = jax.nn.sigmoid(gates)
        tg = jnp.tanh(gates)
        i_g = sg[:, 0 * hid:1 * hid]
        f_g = sg[:, 1 * hid:2 * hid]
        g_g = tg[:, 2 * hid:3 * hid]
        o_g = sg[:, 3 * hid:4 * hid]
        c = f_g * c + i_g * g_g
        h = o_g * jnp.tanh(c)
        hs.append(h)

    # ---- hoisted linear head: one matmul + one lane-dense (T*BP,128) store --
    h_all = jnp.concatenate(hs, axis=0)                             # (T*BP, H)
    out_ref[...] = (jnp.dot(h_all, wlin_ref[...],
                            preferred_element_type=jnp.float32)
                    + blin_ref[...])


def prepare_head_params(w_lin, b_lin):
    """(R4) one-time lane-padding of the linear head to 128 lanes."""
    hid, ncls = w_lin.shape
    w_lin_pad = jnp.zeros((hid, LANE), jnp.float32).at[:, :ncls].set(w_lin)
    b_lin_pad = jnp.zeros((1, LANE), jnp.float32).at[:, :ncls].set(
        b_lin.reshape(1, ncls))
    return w_lin_pad, b_lin_pad


@functools.partial(jax.jit, static_argnames=("num_classes",))
def ner_forward_pallas(token_ids, emb_table, w_ih, w_hh, b, w_lin_pad,
                       b_lin_pad, *, num_classes):
    """token_ids: (B, T) int32 -> logits (T, B, num_classes) float32."""
    batch, seq_len = token_ids.shape

    # (R5) pad batch to one full sublane tile; padded rows read token 0 and are
    # dropped below (every op in the model is row-independent over batch).
    ids_p = jnp.zeros((BPAD, seq_len), jnp.int32).at[:batch].set(token_ids)
    ids_tm = ids_p.T.reshape(seq_len * BPAD, 1)     # time-major: row = t*BP + b

    out = pl.pallas_call(
        functools.partial(ner_kernel, BPAD),
        out_shape=jax.ShapeDtypeStruct((seq_len * BPAD, LANE), jnp.float32),
        in_specs=[pl.BlockSpec(memory_space=pltpu.MemorySpace.VMEM)] * 7,
        out_specs=pl.BlockSpec(memory_space=pltpu.MemorySpace.VMEM),
    )(ids_tm, emb_table, w_ih, w_hh, b, w_lin_pad, b_lin_pad)

    return out.reshape(seq_len, BPAD, LANE)[:, :batch, :num_classes]


def ner_forward_reference(token_ids, emb_table, w_ih, w_hh, b, w_lin, b_lin):
    """Pure-JAX reference (gather + lax.scan LSTM + head) for correctness."""
    H = w_hh.shape[0]
    x_emb = emb_table[token_ids]                 # (B, T, D)
    x_emb = jnp.transpose(x_emb, (1, 0, 2))      # (T, B, D) seq-first

    def step(carry, x_t):
        h, c = carry
        gates = x_t @ w_ih + h @ w_hh + b
        i_g = jax.nn.sigmoid(gates[:, 0 * H:1 * H])
        f_g = jax.nn.sigmoid(gates[:, 1 * H:2 * H])
        g_g = jnp.tanh(gates[:, 2 * H:3 * H])
        o_g = jax.nn.sigmoid(gates[:, 3 * H:4 * H])
        c_new = f_g * c + i_g * g_g
        h_new = o_g * jnp.tanh(c_new)
        return (h_new, c_new), h_new @ w_lin + b_lin

    init = (jnp.zeros((x_emb.shape[1], H), jnp.float32),
            jnp.zeros((x_emb.shape[1], H), jnp.float32))
    _, logits = lax.scan(step, init, x_emb)
    return logits


if __name__ == "__main__":
    key = jax.random.PRNGKey(0)
    keys = jax.random.split(key, 8)

    # --- deterministic parameter init (shapes per NerModel.__init__) ---------
    emb_table = jax.random.normal(keys[0], (VOCAB, EMB), jnp.float32) * 0.1
    w_ih  = jax.random.normal(keys[1], (EMB, 4 * HID), jnp.float32) * 0.1   # LSTM input->gates
    w_hh  = jax.random.normal(keys[2], (HID, 4 * HID), jnp.float32) * 0.1   # LSTM hidden->gates
    b_ih  = jax.random.normal(keys[3], (4 * HID,), jnp.float32) * 0.1
    b_hh  = jax.random.normal(keys[4], (4 * HID,), jnp.float32) * 0.1
    b     = (b_ih + b_hh).reshape(1, 4 * HID)
    w_lin = jax.random.normal(keys[5], (HID, NCLS), jnp.float32) * 0.1      # nn.Linear(hidden_dim, num_classes)
    b_lin = jax.random.normal(keys[6], (NCLS,), jnp.float32).reshape(1, NCLS) * 0.1
    # transition_params exists as a parameter but is unused in forward():
    transition_params = jax.random.normal(keys[7], (NCLS, NCLS), jnp.float32)

    # (R4) one-time parameter prep (lane padding of the head), out of hot path.
    w_lin_pad, b_lin_pad = prepare_head_params(w_lin, b_lin)

    # --- inputs (token ids), plus unused forward args for signature fidelity --
    inputs = jax.random.randint(jax.random.PRNGKey(1), (B, T), 0, VOCAB)     # (B, T) int32
    input_length = jnp.full((B,), T, jnp.int32)                              # unused in forward
    targets = jnp.zeros((B, T), jnp.int32)                                   # unused in forward

    # --- single fused forward: embedding gather + LSTM + head in one kernel --
    # TODO(synk): training-mode dropout (configs.dropout) not applied; forward runs with training=None.
    logits = ner_forward_pallas(inputs, emb_table, w_ih, w_hh, b,
                                w_lin_pad, b_lin_pad, num_classes=NCLS)
    logits = jax.block_until_ready(logits)

    ref = ner_forward_reference(inputs, emb_table, w_ih, w_hh, b, w_lin, b_lin)
    assert logits.shape == (T, B, NCLS)
    np.testing.assert_allclose(np.asarray(logits), np.asarray(ref),
                               rtol=1e-5, atol=1e-5)
    print("KERNEL_OK")
</pallas_src>

<mosaic_0001>
module attributes {stable_mosaic.version = 11 : i64} {
  func.func @ner_kernel(%arg0: memref<64x1xi32, #tpu.memory_space<vmem>>, %arg1: memref<64x32xf32, #tpu.memory_space<vmem>>, %arg2: memref<32x128xf32, #tpu.memory_space<vmem>>, %arg3: memref<32x128xf32, #tpu.memory_space<vmem>>, %arg4: memref<1x128xf32, #tpu.memory_space<vmem>>, %arg5: memref<32x128xf32, #tpu.memory_space<vmem>>, %arg6: memref<1x128xf32, #tpu.memory_space<vmem>>, %arg7: memref<64x128xf32, #tpu.memory_space<vmem>>) attributes {dimension_semantics = [], scalar_prefetch = 0 : i64, scratch_operands = 0 : i64, tpu.core_type = #tpu.core_type<tc>} {
    %c0 = arith.constant 0 : index
    %c0_0 = arith.constant 0 : index
    %0 = vector.load %arg0[%c0, %c0_0] : memref<64x1xi32, #tpu.memory_space<vmem>>, vector<64x1xi32>
    %1 = tpu.iota {dimensions = array<i32: 1>} : vector<64x64xi32>
    %2 = vector.broadcast %0 : vector<64x1xi32> to vector<64x64xi32>
    %3 = arith.cmpi eq, %1, %2 : vector<64x64xi32>
    %4 = arith.extui %3 : vector<64x64xi1> to vector<64x64xi32>
    %5 = arith.sitofp %4 : vector<64x64xi32> to vector<64x64xf32>
    %c0_1 = arith.constant 0 : index
    %c0_2 = arith.constant 0 : index
    %6 = vector.load %arg1[%c0_1, %c0_2] : memref<64x32xf32, #tpu.memory_space<vmem>>, vector<64x32xf32>
    %cst = arith.constant dense<0.000000e+00> : vector<64x32xf32>
    %7 = tpu.matmul %5, %6, %cst {dimension_numbers = #tpu.dot_dimension_numbers<[1], [0], [0], [1], [0, 0, 1, 1], [], []>} : vector<64x64xf32>, vector<64x32xf32>, vector<64x32xf32> -> vector<64x32xf32>
    %c0_3 = arith.constant 0 : index
    %c0_4 = arith.constant 0 : index
    %8 = vector.load %arg2[%c0_3, %c0_4] : memref<32x128xf32, #tpu.memory_space<vmem>>, vector<32x128xf32>
    %cst_5 = arith.constant dense<0.000000e+00> : vector<64x128xf32>
    %9 = tpu.matmul %7, %8, %cst_5 {dimension_numbers = #tpu.dot_dimension_numbers<[1], [0], [0], [1], [0, 0, 1, 1], [], []>} : vector<64x32xf32>, vector<32x128xf32>, vector<64x128xf32> -> vector<64x128xf32>
    %c0_6 = arith.constant 0 : index
    %c0_7 = arith.constant 0 : index
    %10 = vector.load %arg4[%c0_6, %c0_7] : memref<1x128xf32, #tpu.memory_space<vmem>>, vector<1x128xf32>
    %11 = vector.broadcast %10 : vector<1x128xf32> to vector<64x128xf32>
    %12 = arith.addf %9, %11 : vector<64x128xf32>
    %c0_8 = arith.constant 0 : index
    %c0_9 = arith.constant 0 : index
    %13 = vector.load %arg3[%c0_8, %c0_9] : memref<32x128xf32, #tpu.memory_space<vmem>>, vector<32x128xf32>
    %cst_10 = arith.constant 0.000000e+00 : f32
    %14 = vector.broadcast %cst_10 : f32 to vector<8x32xf32>
    %cst_11 = arith.constant 0.000000e+00 : f32
    %15 = vector.broadcast %cst_11 : f32 to vector<8x32xf32>
    %16 = vector.extract_strided_slice %12 {offsets = [0, 0], sizes = [8, 128], strides = [1, 1]} : vector<64x128xf32> to vector<8x128xf32>
    %cst_12 = arith.constant dense<0.000000e+00> : vector<8x128xf32>
    %17 = tpu.matmul %14, %13, %cst_12 {dimension_numbers = #tpu.dot_dimension_numbers<[1], [0], [0], [1], [0, 0, 1, 1], [], []>} : vector<8x32xf32>, vector<32x128xf32>, vector<8x128xf32> -> vector<8x128xf32>
    %18 = arith.addf %16, %17 : vector<8x128xf32>
    %19 = arith.negf %18 : vector<8x128xf32>
    %20 = math.exp %19 : vector<8x128xf32>
    %cst_13 = arith.constant 1.000000e+00 : f32
    %21 = vector.broadcast %cst_13 : f32 to vector<8x128xf32>
    %22 = arith.addf %21, %20 : vector<8x128xf32>
    %23 = arith.divf %21, %22 : vector<8x128xf32>
    %24 = math.tanh %18 : vector<8x128xf32>
    %25 = vector.extract_strided_slice %23 {offsets = [0, 0], sizes = [8, 32], strides = [1, 1]} : vector<8x128xf32> to vector<8x32xf32>
    %26 = vector.extract_strided_slice %23 {offsets = [0, 32], sizes = [8, 32], strides = [1, 1]} : vector<8x128xf32> to vector<8x32xf32>
    %27 = vector.extract_strided_slice %24 {offsets = [0, 64], sizes = [8, 32], strides = [1, 1]} : vector<8x128xf32> to vector<8x32xf32>
    %28 = vector.extract_strided_slice %23 {offsets = [0, 96], sizes = [8, 32], strides = [1, 1]} : vector<8x128xf32> to vector<8x32xf32>
    %29 = arith.mulf %26, %15 : vector<8x32xf32>
    %30 = arith.mulf %25, %27 : vector<8x32xf32>
    %31 = arith.addf %29, %30 : vector<8x32xf32>
    %32 = math.tanh %31 : vector<8x32xf32>
    %33 = arith.mulf %28, %32 : vector<8x32xf32>
    %34 = vector.extract_strided_slice %12 {offsets = [8, 0], sizes = [8, 128], strides = [1, 1]} : vector<64x128xf32> to vector<8x128xf32>
    %cst_14 = arith.constant dense<0.000000e+00> : vector<8x128xf32>
    %35 = tpu.matmul %33, %13, %cst_14 {dimension_numbers = #tpu.dot_dimension_numbers<[1], [0], [0], [1], [0, 0, 1, 1], [], []>} : vector<8x32xf32>, vector<32x128xf32>, vector<8x128xf32> -> vector<8x128xf32>
    %36 = arith.addf %34, %35 : vector<8x128xf32>
    %37 = arith.negf %36 : vector<8x128xf32>
    %38 = math.exp %37 : vector<8x128xf32>
    %cst_15 = arith.constant 1.000000e+00 : f32
    %39 = vector.broadcast %cst_15 : f32 to vector<8x128xf32>
    %40 = arith.addf %39, %38 : vector<8x128xf32>
    %41 = arith.divf %39, %40 : vector<8x128xf32>
    %42 = math.tanh %36 : vector<8x128xf32>
    %43 = vector.extract_strided_slice %41 {offsets = [0, 0], sizes = [8, 32], strides = [1, 1]} : vector<8x128xf32> to vector<8x32xf32>
    %44 = vector.extract_strided_slice %41 {offsets = [0, 32], sizes = [8, 32], strides = [1, 1]} : vector<8x128xf32> to vector<8x32xf32>
    %45 = vector.extract_strided_slice %42 {offsets = [0, 64], sizes = [8, 32], strides = [1, 1]} : vector<8x128xf32> to vector<8x32xf32>
    %46 = vector.extract_strided_slice %41 {offsets = [0, 96], sizes = [8, 32], strides = [1, 1]} : vector<8x128xf32> to vector<8x32xf32>
    %47 = arith.mulf %44, %31 : vector<8x32xf32>
    %48 = arith.mulf %43, %45 : vector<8x32xf32>
    %49 = arith.addf %47, %48 : vector<8x32xf32>
    %50 = math.tanh %49 : vector<8x32xf32>
    %51 = arith.mulf %46, %50 : vector<8x32xf32>
    %52 = vector.extract_strided_slice %12 {offsets = [16, 0], sizes = [8, 128], strides = [1, 1]} : vector<64x128xf32> to vector<8x128xf32>
    %cst_16 = arith.constant dense<0.000000e+00> : vector<8x128xf32>
    %53 = tpu.matmul %51, %13, %cst_16 {dimension_numbers = #tpu.dot_dimension_numbers<[1], [0], [0], [1], [0, 0, 1, 1], [], []>} : vector<8x32xf32>, vector<32x128xf32>, vector<8x128xf32> -> vector<8x128xf32>
    %54 = arith.addf %52, %53 : vector<8x128xf32>
    %55 = arith.negf %54 : vector<8x128xf32>
    %56 = math.exp %55 : vector<8x128xf32>
    %cst_17 = arith.constant 1.000000e+00 : f32
    %57 = vector.broadcast %cst_17 : f32 to vector<8x128xf32>
    %58 = arith.addf %57, %56 : vector<8x128xf32>
    %59 = arith.divf %57, %58 : vector<8x128xf32>
    %60 = math.tanh %54 : vector<8x128xf32>
    %61 = vector.extract_strided_slice %59 {offsets = [0, 0], sizes = [8, 32], strides = [1, 1]} : vector<8x128xf32> to vector<8x32xf32>
    %62 = vector.extract_strided_slice %59 {offsets = [0, 32], sizes = [8, 32], strides = [1, 1]} : vector<8x128xf32> to vector<8x32xf32>
    %63 = vector.extract_strided_slice %60 {offsets = [0, 64], sizes = [8, 32], strides = [1, 1]} : vector<8x128xf32> to vector<8x32xf32>
    %64 = vector.extract_strided_slice %59 {offsets = [0, 96], sizes = [8, 32], strides = [1, 1]} : vector<8x128xf32> to vector<8x32xf32>
    %65 = arith.mulf %62, %49 : vector<8x32xf32>
    %66 = arith.mulf %61, %63 : vector<8x32xf32>
    %67 = arith.addf %65, %66 : vector<8x32xf32>
    %68 = math.tanh %67 : vector<8x32xf32>
    %69 = arith.mulf %64, %68 : vector<8x32xf32>
    %70 = vector.extract_strided_slice %12 {offsets = [24, 0], sizes = [8, 128], strides = [1, 1]} : vector<64x128xf32> to vector<8x128xf32>
    %cst_18 = arith.constant dense<0.000000e+00> : vector<8x128xf32>
    %71 = tpu.matmul %69, %13, %cst_18 {dimension_numbers = #tpu.dot_dimension_numbers<[1], [0], [0], [1], [0, 0, 1, 1], [], []>} : vector<8x32xf32>, vector<32x128xf32>, vector<8x128xf32> -> vector<8x128xf32>
    %72 = arith.addf %70, %71 : vector<8x128xf32>
    %73 = arith.negf %72 : vector<8x128xf32>
    %74 = math.exp %73 : vector<8x128xf32>
    %cst_19 = arith.constant 1.000000e+00 : f32
    %75 = vector.broadcast %cst_19 : f32 to vector<8x128xf32>
    %76 = arith.addf %75, %74 : vector<8x128xf32>
    %77 = arith.divf %75, %76 : vector<8x128xf32>
    %78 = math.tanh %72 : vector<8x128xf32>
    %79 = vector.extract_strided_slice %77 {offsets = [0, 0], sizes = [8, 32], strides = [1, 1]} : vector<8x128xf32> to vector<8x32xf32>
    %80 = vector.extract_strided_slice %77 {offsets = [0, 32], sizes = [8, 32], strides = [1, 1]} : vector<8x128xf32> to vector<8x32xf32>
    %81 = vector.extract_strided_slice %78 {offsets = [0, 64], sizes = [8, 32], strides = [1, 1]} : vector<8x128xf32> to vector<8x32xf32>
    %82 = vector.extract_strided_slice %77 {offsets = [0, 96], sizes = [8, 32], strides = [1, 1]} : vector<8x128xf32> to vector<8x32xf32>
    %83 = arith.mulf %80, %67 : vector<8x32xf32>
    %84 = arith.mulf %79, %81 : vector<8x32xf32>
    %85 = arith.addf %83, %84 : vector<8x32xf32>
    %86 = math.tanh %85 : vector<8x32xf32>
    %87 = arith.mulf %82, %86 : vector<8x32xf32>
    %88 = vector.extract_strided_slice %12 {offsets = [32, 0], sizes = [8, 128], strides = [1, 1]} : vector<64x128xf32> to vector<8x128xf32>
    %cst_20 = arith.constant dense<0.000000e+00> : vector<8x128xf32>
    %89 = tpu.matmul %87, %13, %cst_20 {dimension_numbers = #tpu.dot_dimension_numbers<[1], [0], [0], [1], [0, 0, 1, 1], [], []>} : vector<8x32xf32>, vector<32x128xf32>, vector<8x128xf32> -> vector<8x128xf32>
    %90 = arith.addf %88, %89 : vector<8x128xf32>
    %91 = arith.negf %90 : vector<8x128xf32>
    %92 = math.exp %91 : vector<8x128xf32>
    %cst_21 = arith.constant 1.000000e+00 : f32
    %93 = vector.broadcast %cst_21 : f32 to vector<8x128xf32>
    %94 = arith.addf %93, %92 : vector<8x128xf32>
    %95 = arith.divf %93, %94 : vector<8x128xf32>
    %96 = math.tanh %90 : vector<8x128xf32>
    %97 = vector.extract_strided_slice %95 {offsets = [0, 0], sizes = [8, 32], strides = [1, 1]} : vector<8x128xf32> to vector<8x32xf32>
    %98 = vector.extract_strided_slice %95 {offsets = [0, 32], sizes = [8, 32], strides = [1, 1]} : vector<8x128xf32> to vector<8x32xf32>
    %99 = vector.extract_strided_slice %96 {offsets = [0, 64], sizes = [8, 32], strides = [1, 1]} : vector<8x128xf32> to vector<8x32xf32>
    %100 = vector.extract_strided_slice %95 {offsets = [0, 96], sizes = [8, 32], strides = [1, 1]} : vector<8x128xf32> to vector<8x32xf32>
    %101 = arith.mulf %98, %85 : vector<8x32xf32>
    %102 = arith.mulf %97, %99 : vector<8x32xf32>
    %103 = arith.addf %101, %102 : vector<8x32xf32>
    %104 = math.tanh %103 : vector<8x32xf32>
    %105 = arith.mulf %100, %104 : vector<8x32xf32>
    %106 = vector.extract_strided_slice %12 {offsets = [40, 0], sizes = [8, 128], strides = [1, 1]} : vector<64x128xf32> to vector<8x128xf32>
    %cst_22 = arith.constant dense<0.000000e+00> : vector<8x128xf32>
    %107 = tpu.matmul %105, %13, %cst_22 {dimension_numbers = #tpu.dot_dimension_numbers<[1], [0], [0], [1], [0, 0, 1, 1], [], []>} : vector<8x32xf32>, vector<32x128xf32>, vector<8x128xf32> -> vector<8x128xf32>
    %108 = arith.addf %106, %107 : vector<8x128xf32>
    %109 = arith.negf %108 : vector<8x128xf32>
    %110 = math.exp %109 : vector<8x128xf32>
    %cst_23 = arith.constant 1.000000e+00 : f32
    %111 = vector.broadcast %cst_23 : f32 to vector<8x128xf32>
    %112 = arith.addf %111, %110 : vector<8x128xf32>
    %113 = arith.divf %111, %112 : vector<8x128xf32>
    %114 = math.tanh %108 : vector<8x128xf32>
    %115 = vector.extract_strided_slice %113 {offsets = [0, 0], sizes = [8, 32], strides = [1, 1]} : vector<8x128xf32> to vector<8x32xf32>
    %116 = vector.extract_strided_slice %113 {offsets = [0, 32], sizes = [8, 32], strides = [1, 1]} : vector<8x128xf32> to vector<8x32xf32>
    %117 = vector.extract_strided_slice %114 {offsets = [0, 64], sizes = [8, 32], strides = [1, 1]} : vector<8x128xf32> to vector<8x32xf32>
    %118 = vector.extract_strided_slice %113 {offsets = [0, 96], sizes = [8, 32], strides = [1, 1]} : vector<8x128xf32> to vector<8x32xf32>
    %119 = arith.mulf %116, %103 : vector<8x32xf32>
    %120 = arith.mulf %115, %117 : vector<8x32xf32>
    %121 = arith.addf %119, %120 : vector<8x32xf32>
    %122 = math.tanh %121 : vector<8x32xf32>
    %123 = arith.mulf %118, %122 : vector<8x32xf32>
    %124 = vector.extract_strided_slice %12 {offsets = [48, 0], sizes = [8, 128], strides = [1, 1]} : vector<64x128xf32> to vector<8x128xf32>
    %cst_24 = arith.constant dense<0.000000e+00> : vector<8x128xf32>
    %125 = tpu.matmul %123, %13, %cst_24 {dimension_numbers = #tpu.dot_dimension_numbers<[1], [0], [0], [1], [0, 0, 1, 1], [], []>} : vector<8x32xf32>, vector<32x128xf32>, vector<8x128xf32> -> vector<8x128xf32>
    %126 = arith.addf %124, %125 : vector<8x128xf32>
    %127 = arith.negf %126 : vector<8x128xf32>
    %128 = math.exp %127 : vector<8x128xf32>
    %cst_25 = arith.constant 1.000000e+00 : f32
    %129 = vector.broadcast %cst_25 : f32 to vector<8x128xf32>
    %130 = arith.addf %129, %128 : vector<8x128xf32>
    %131 = arith.divf %129, %130 : vector<8x128xf32>
    %132 = math.tanh %126 : vector<8x128xf32>
    %133 = vector.extract_strided_slice %131 {offsets = [0, 0], sizes = [8, 32], strides = [1, 1]} : vector<8x128xf32> to vector<8x32xf32>
    %134 = vector.extract_strided_slice %131 {offsets = [0, 32], sizes = [8, 32], strides = [1, 1]} : vector<8x128xf32> to vector<8x32xf32>
    %135 = vector.extract_strided_slice %132 {offsets = [0, 64], sizes = [8, 32], strides = [1, 1]} : vector<8x128xf32> to vector<8x32xf32>
    %136 = vector.extract_strided_slice %131 {offsets = [0, 96], sizes = [8, 32], strides = [1, 1]} : vector<8x128xf32> to vector<8x32xf32>
    %137 = arith.mulf %134, %121 : vector<8x32xf32>
    %138 = arith.mulf %133, %135 : vector<8x32xf32>
    %139 = arith.addf %137, %138 : vector<8x32xf32>
    %140 = math.tanh %139 : vector<8x32xf32>
    %141 = arith.mulf %136, %140 : vector<8x32xf32>
    %142 = vector.extract_strided_slice %12 {offsets = [56, 0], sizes = [8, 128], strides = [1, 1]} : vector<64x128xf32> to vector<8x128xf32>
    %cst_26 = arith.constant dense<0.000000e+00> : vector<8x128xf32>
    %143 = tpu.matmul %141, %13, %cst_26 {dimension_numbers = #tpu.dot_dimension_numbers<[1], [0], [0], [1], [0, 0, 1, 1], [], []>} : vector<8x32xf32>, vector<32x128xf32>, vector<8x128xf32> -> vector<8x128xf32>
    %144 = arith.addf %142, %143 : vector<8x128xf32>
    %145 = arith.negf %144 : vector<8x128xf32>
    %146 = math.exp %145 : vector<8x128xf32>
    %cst_27 = arith.constant 1.000000e+00 : f32
    %147 = vector.broadcast %cst_27 : f32 to vector<8x128xf32>
    %148 = arith.addf %147, %146 : vector<8x128xf32>
    %149 = arith.divf %147, %148 : vector<8x128xf32>
    %150 = math.tanh %144 : vector<8x128xf32>
    %151 = vector.extract_strided_slice %149 {offsets = [0, 0], sizes = [8, 32], strides = [1, 1]} : vector<8x128xf32> to vector<8x32xf32>
    %152 = vector.extract_strided_slice %149 {offsets = [0, 32], sizes = [8, 32], strides = [1, 1]} : vector<8x128xf32> to vector<8x32xf32>
    %153 = vector.extract_strided_slice %150 {offsets = [0, 64], sizes = [8, 32], strides = [1, 1]} : vector<8x128xf32> to vector<8x32xf32>
    %154 = vector.extract_strided_slice %149 {offsets = [0, 96], sizes = [8, 32], strides = [1, 1]} : vector<8x128xf32> to vector<8x32xf32>
    %155 = arith.mulf %152, %139 : vector<8x32xf32>
    %156 = arith.mulf %151, %153 : vector<8x32xf32>
    %157 = arith.addf %155, %156 : vector<8x32xf32>
    %158 = math.tanh %157 : vector<8x32xf32>
    %159 = arith.mulf %154, %158 : vector<8x32xf32>
    %160 = tpu.concatenate %33, %51, %69, %87, %105, %123, %141, %159 in 0 : vector<8x32xf32>, vector<8x32xf32>, vector<8x32xf32>, vector<8x32xf32>, vector<8x32xf32>, vector<8x32xf32>, vector<8x32xf32>, vector<8x32xf32> -> vector<64x32xf32>
    %c0_28 = arith.constant 0 : index
    %c0_29 = arith.constant 0 : index
    %161 = vector.load %arg5[%c0_28, %c0_29] : memref<32x128xf32, #tpu.memory_space<vmem>>, vector<32x128xf32>
    %cst_30 = arith.constant dense<0.000000e+00> : vector<64x128xf32>
    %162 = tpu.matmul %160, %161, %cst_30 {dimension_numbers = #tpu.dot_dimension_numbers<[1], [0], [0], [1], [0, 0, 1, 1], [], []>} : vector<64x32xf32>, vector<32x128xf32>, vector<64x128xf32> -> vector<64x128xf32>
    %c0_31 = arith.constant 0 : index
    %c0_32 = arith.constant 0 : index
    %163 = vector.load %arg6[%c0_31, %c0_32] : memref<1x128xf32, #tpu.memory_space<vmem>>, vector<1x128xf32>
    %164 = vector.broadcast %163 : vector<1x128xf32> to vector<64x128xf32>
    %165 = arith.addf %162, %164 : vector<64x128xf32>
    %c0_33 = arith.constant 0 : index
    %c0_34 = arith.constant 0 : index
    %166 = vector.load %arg7[%c0_33, %c0_34] : memref<64x128xf32, #tpu.memory_space<vmem>>, vector<64x128xf32>
    tpu.vector_store %arg7[%c0_33, %c0_34], %165 {strides = array<i32>} : memref<64x128xf32, #tpu.memory_space<vmem>>, vector<64x128xf32>,
    return
  }
}

</mosaic_0001>

<bundles_post_ra>
// kernel: ner_forward_pallas.1
= control target key start
LH: loop header
LB: loop body
LE: loop exit
PB: predicated region body
PF: predicated region fallthrough
CT: control target
= control target key end

     0   :  { %v1739_v0 = vmov 0   ;;  %v34_v27 = vlaneseq  ;;  %vm92_vm0 = vcmask 523264   ;;  %v1740_v31 = vmov 0.0   ;;  %s1744_s24 = smov 32   ;;  %s2067_s0 = inlined_call_operand.vmem [shape: s32[64,1], index: 0, kind: input, shape index: {}]   ;;  %s2068_s1 = inlined_call_operand.vmem [shape: f32[64,32], index: 1, kind: input, shape index: {}]   ;;  %s2069_s2 = inlined_call_operand.vmem [shape: f32[32,128], index: 2, kind: input, shape index: {}]   ;;  %s2070_s3 = inlined_call_operand.vmem [shape: f32[32,128], index: 3, kind: input, shape index: {}]   ;;  %s2071_s4 = inlined_call_operand.vmem [shape: f32[1,128], index: 4, kind: input, shape index: {}]   ;;  %s2072_s5 = inlined_call_operand.vmem [shape: f32[32,128], index: 5, kind: input, shape index: {}]   ;;  %s2073_s6 = inlined_call_operand.vmem [shape: f32[1,128], index: 6, kind: input, shape index: {}]   ;;  %s2074_s7 = inlined_call_operand.vmem [shape: f32[64,128], index: 7, kind: output, shape index: {}]  }
   0x1   :  { %1674 = vset.pattern.permute.xlu1 %v1739_v0  ;;  %1673 = vset.pattern.permute.xlu0 %v1739_v0  ;;  %v28_v1 = vld [vmem:[%s2067_s0 + $0x10] sm:$0xff]  ;;  %v26_v2 = vld [vmem:[%s2067_s0] sm:$0xff]  ;;  %v29_v3 = vld [vmem:[%s2067_s0 + $0x18] sm:$0xff]  ;;  %v1741_v46 = vmov 0.0|0.0   ;;  %vm233_vm9 = vcmask 261120   ;;  %vm1742_vm10 = vmmov 0  }
   0x2   :  { %43 = vperm.xlu1 %1674, %v28_v1   ;;  %37 = vperm.xlu0 %1673, %v26_v2   ;;  %v27_v4 = vld [vmem:[%s2067_s0 + $0x8] sm:$0xff]  ;;  %v84_v5 = vld [vmem:[%s2068_s1] sm:$0xff]  ;;  %v86_v7 = vld [vmem:[%s2068_s1 + $0x10] sm:$0xff]  ;;  %v35_v28 = vand.u32 127, %v34_v27 }
   0x3   :  { %v85_v6 = vld [vmem:[%s2068_s1 + $0x8] sm:$0xff]  ;;  %v87_v8 = vld [vmem:[%s2068_s1 + $0x18] sm:$0xff]  ;;  %v88_v11 = vld [vmem:[%s2068_s1 + $0x20] sm:$0xff] }
   0x4   :  { %v1583_v9 = vpack.c.bf16 %v85_v6, %v84_v5  ;;  %v1587_v10 = vpack.c.bf16 %v87_v8, %v86_v7  ;;  %v89_v12 = vld [vmem:[%s2068_s1 + $0x28] sm:$0xff]  ;;  %v30_v14 = vld [vmem:[%s2067_s0 + $0x20] sm:$0xff]  ;;  %v90_v16 = vld [vmem:[%s2068_s1 + $0x30] sm:$0xff] }
   0x5   :  { %v31_v13 = vld [vmem:[%s2067_s0 + $0x28] sm:$0xff]  ;;  %v1591_v15 = vpack.c.bf16 %v89_v12, %v88_v11  ;;  %v91_v17 = vld [vmem:[%s2068_s1 + $0x38] sm:$0xff]  ;;  %v32_v19 = vld [vmem:[%s2067_s0 + $0x30] sm:$0xff] }
   0x6   :  { %46 = vperm.xlu1 %1674, %v29_v3   ;;  %40 = vperm.xlu0 %1673, %v27_v4   ;;  %v33_v18 = vld [vmem:[%s2067_s0 + $0x38] sm:$0xff]  ;;  %v1595_v20 = vpack.c.bf16 %v91_v17, %v90_v16  ;;  %v222_v21 = vld [vmem:[%s2069_s2] sm:$0xff]  ;;  %v223_v22 = vld [vmem:[%s2069_s2 + $0x8] sm:$0xff] }
   0x7   :  { %1584 = vmatprep.subr.bf16.mxu0 %v1583_v9  ;;  %v224_v23 = vld [vmem:[%s2069_s2 + $0x10] sm:$0xff]  ;;  %v1599_v24 = vpack.c.bf16 %v223_v22, %v222_v21  ;;  %v225_v25 = vld [vmem:[%s2069_s2 + $0x18] sm:$0xff]  ;;  %v363_v47 = vld [vmem:[%s2070_s3] sm:$0xff] }
   0x8   :  { %1586 = vmatpush3.bf16.msra.mxu0 %v1583_v9  ;;  %v1603_v26 = vpack.c.bf16 %v225_v25, %v224_v23  ;;  %v364_v48 = vld [vmem:[%s2070_s3 + $0x8] sm:$0xff]  ;;  %v365_v52 = vld [vmem:[%s2070_s3 + $0x10] sm:$0xff]  ;;  %v366_v53 = vld [vmem:[%s2070_s3 + $0x18] sm:$0xff] }
   0x9   :  { %1588 = vmatprep.subr.bf16.mxu0 %v1587_v10  ;;  %1663 = vmatprep.subr.bf16.mxu1 %v1599_v24  ;;  %v1870_v51 = vpack.c.bf16 %v364_v48, %v363_v47  ;;  %v1882_v56 = vpack.c.bf16 %v366_v53, %v365_v52  ;;  %v1314_v61 = vld [vmem:[%s2071_s4] ss:$0 sm:$0xff]  ;;  %s1743_s4 = smov 64  }
   0xa   :  { %52 = vperm.xlu1 %1674, %v31_v13   ;;  %49 = vperm.xlu0 %1673, %v30_v14  }
   0xb   :  { %1665 = vmatpush3.bf16.msra.mxu1 %v1599_v24 }
   0xc   :  { %1590 = vmatpush3.bf16.msra.mxu0 %v1587_v10  ;;  %1664 = vmatprep.subr.bf16.mxu1 %v1603_v26 }
   0xd   :  { %1592 = vmatprep.subr.bf16.mxu0 %v1591_v15 }
   0xe   :  { %58 = vperm.xlu1 %1674, %v33_v18   ;;  %55 = vperm.xlu0 %1673, %v32_v19  }
   0xf   :  { %1666 = vmatpush3.bf16.msra.mxu1 %v1603_v26 }
  0x10   :  { %1594 = vmatpush3.bf16.msra.mxu0 %v1591_v15  ;;  %1607 = vmatprep.subr.bf16.mxu1 %v1741_v46 }
  0x11   :  { %1596 = vmatprep.subr.bf16.mxu0 %v1595_v20 }
  0x14   :  { %1598 = vmatpush3.bf16.msra.mxu0 %v1595_v20 }
  0x15   :  { %1600 = vmatprep.subr.bf16.mxu0 %v1599_v24 }
  0x81   :  { %v44_v29 = vpop.permute.xlu1 %43  ;;  %v38_v30 = vpop.permute.xlu0 %37 }
  0x82   :  { %vm60_vm1 = vcmp.eq.s32.totalorder %v35_v28, %v38_v30  ;;  %vm62_vm2 = vcmp.eq.s32.totalorder %v35_v28, %v44_v29 }
  0x83   :  { %v1298_v32 = vsel %vm60_vm1, 1.0, %v1740_v31  ;;  %v1300_v35 = vsel %vm62_vm2, 1.0, %v1740_v31 }
  0x84   :  { %1443 = vmatprep.mubr.msk.f32.mxu0 %vm92_vm0, %v1298_v32 }
  0x85   :  { %v47_v33 = vpop.permute.xlu1 %46  ;;  %v41_v34 = vpop.permute.xlu0 %40 }
  0x86   :  { %vm61_vm3 = vcmp.eq.s32.totalorder %v35_v28, %v41_v34  ;;  %vm63_vm4 = vcmp.eq.s32.totalorder %v35_v28, %v47_v33 }
  0x87   :  { %v1299_v36 = vsel %vm61_vm3, 1.0, %v1740_v31  ;;  %v1301_v39 = vsel %vm63_vm4, 1.0, %v1740_v31 }
  0x88   :  { %1444 = vmatmul.mubr.msk.f32.vlgmr.msra.gmra.mrb[0].mxu0 %vm92_vm0, %v1299_v36 }
  0x89   :  { %v53_v37 = vpop.permute.xlu1 %52  ;;  %1446 = vmatprep.mubr.msk.f32.mxu0 %vm92_vm0, %v1300_v35  ;;  %v50_v38 = vpop.permute.xlu0 %49  ;;  %1602 = vmatpush3.bf16.msra.mxu0 %v1599_v24 }
  0x8a   :  { %vm64_vm5 = vcmp.eq.s32.totalorder %v35_v28, %v50_v38  ;;  %1604 = vmatprep.subr.bf16.mxu0 %v1603_v26  ;;  %vm65_vm6 = vcmp.eq.s32.totalorder %v35_v28, %v53_v37 }
  0x8b   :  { %v1302_v40 = vsel %vm64_vm5, 1.0, %v1740_v31  ;;  %v1303_v43 = vsel %vm65_vm6, 1.0, %v1740_v31 }
  0x8c   :  { %1447 = vmatmul.mubr.msk.f32.gmra.mrb[2].mxu0 %vm92_vm0, %v1301_v39 }
  0x8d   :  { %v59_v41 = vpop.permute.xlu1 %58  ;;  %1449 = vmatprep.mubr.msk.f32.mxu0 %vm92_vm0, %v1302_v40  ;;  %v56_v42 = vpop.permute.xlu0 %55  ;;  %1606 = vmatpush3.bf16.msra.mxu0 %v1603_v26 }
  0x8e   :  { %vm66_vm7 = vcmp.eq.s32.totalorder %v35_v28, %v56_v42  ;;  %vm67_vm8 = vcmp.eq.s32.totalorder %v35_v28, %v59_v41  ;;  %1613 = vmatprep.subr.bf16.mxu0 %v1741_v46 }
  0x8f   :  { %v1304_v44 = vsel %vm66_vm7, 1.0, %v1740_v31  ;;  %v1305_v45 = vsel %vm67_vm8, 1.0, %v1740_v31 }
  0x90   :  { %1450 = vmatmul.mubr.msk.f32.gmra.mrb[4].mxu0 %vm92_vm0, %v1303_v43 }
  0x91   :  { %1452 = vmatprep.mubr.msk.f32.mxu0 %vm92_vm0, %v1304_v44 }
  0x94   :  { %1453 = vmatmul.mubr.msk.f32.gmra.mrb[6].mxu0 %vm92_vm0, %v1305_v45 }
 0x15b   :  { %v1445_v49 = vpop.f32.mrb[0].mxu0 }
 0x15c   :  { %v183_v50 = vpop.f32.mrb[1].mxu0 }
 0x15d   :  { %1463 = vmatprep.mubr.msk.f32.mxu0 %vm233_vm9, %v183_v50 }
 0x15e   :  { %1464 = vmatmul.mubr.msk.f32.vlgmr.msra.gmra.mrb[8].mxu0 %vm233_vm9, %v1445_v49 }
 0x15f   :  { %v1448_v54 = vpop.f32.mrb[2].mxu0  ;;  %1615 = vmatpush3.bf16.msra.mxu0 %v1870_v51 }
 0x160   :  { %v193_v55 = vpop.f32.mrb[3].mxu0  ;;  %1616 = vmatprep.subr.bf16.mxu0 %v1741_v46 }
 0x161   :  { %1466 = vmatprep.mubr.msk.f32.mxu0 %vm233_vm9, %v193_v55 }
 0x162   :  { %1467 = vmatmul.mubr.msk.f32.gmra.mrb[10].mxu0 %vm233_vm9, %v1448_v54 }
 0x163   :  { %v1451_v57 = vpop.f32.mrb[4].mxu0  ;;  %1618 = vmatpush3.bf16.msra.mxu0 %v1882_v56  ;;  %1494 = vmatprep.mubr.msk.f32.mxu0 %vm1742_vm10, %v1740_v31 }
 0x164   :  { %v203_v58 = vpop.f32.mrb[5].mxu0  ;;  %1625 = vmatprep.subr.bf16.mxu0 %v1741_v46 }
 0x165   :  { %1469 = vmatprep.mubr.msk.f32.mxu1 %vm233_vm9, %v203_v58 }
 0x166   :  { %1470 = vmatmul.mubr.msk.f32.vlgmr.msra.gmra.mrb[0].mxu1 %vm233_vm9, %v1451_v57 }
 0x167   :  { %1609 = vmatpush3.bf16.msra.mxu1 %v1870_v51  ;;  %v1454_v59 = vpop.f32.mrb[6].mxu0 }
 0x168   :  { %v213_v60 = vpop.f32.mrb[7].mxu0  ;;  %1610 = vmatprep.subr.bf16.mxu1 %v1741_v46 }
 0x169   :  { %1472 = vmatprep.mubr.msk.f32.mxu1 %vm233_vm9, %v213_v60 }
 0x16a   :  { %1473 = vmatmul.mubr.msk.f32.gmra.mrb[2].mxu1 %vm233_vm9, %v1454_v59 }
 0x16b   :  { %1612 = vmatpush3.bf16.msra.mxu1 %v1882_v56  ;;  %1483 = vmatprep.mubr.msk.f32.mxu1 %vm1742_vm10, %v1740_v31 }
 0x16c   :  { %1619 = vmatprep.subr.bf16.mxu1 %v1741_v46 }
 0x16e   :  { %1484 = vmatmul.mubr.f32.vlgmr.msra.gmra.mrb[4].mxu1 %v1740_v31 }
 0x16f   :  { %1621 = vmatpush3.bf16.msra.mxu1 %v1870_v51  ;;  %1505 = vmatprep.mubr.msk.f32.mxu1 %vm1742_vm10, %v1740_v31 }
 0x170   :  { %1622 = vmatprep.subr.bf16.mxu1 %v1741_v46 }
 0x173   :  { %1624 = vmatpush3.bf16.msra.mxu1 %v1882_v56 }
 0x174   :  { %1631 = vmatprep.subr.bf16.mxu1 %v1741_v46 }
 0x231   :  { %v1465_v62 = vpop.f32.mrb[8].mxu0 }
 0x232   :  { %v330_v63 = vadd.f32 %v1465_v62, %v1314_v61  ;;  %v324_v0 = vpop.f32.mrb[9].mxu0 }
 0x233   :  { %v325_v13 = vadd.f32 %v1314_v61, %v324_v0 }
 0x235   :  { %v1468_v1 = vpop.f32.mrb[10].mxu0 }
 0x236   :  { %v1909_v2 = vadd.f32 %v1468_v1, %v1314_v61  ;;  %v334_v3 = vpop.f32.mrb[11].mxu0 }
 0x237   :  { %v1911_v4 = vadd.f32 %v1314_v61, %v334_v3 }
 0x239   :  { %v1471_v5 = vpop.f32.mrb[0].mxu1 }
 0x23a   :  { %v1913_v6 = vadd.f32 %v1471_v5, %v1314_v61  ;;  %v344_v7 = vpop.f32.mrb[1].mxu1 }
 0x23b   :  { %v1915_v8 = vadd.f32 %v1314_v61, %v344_v7 }
 0x23d   :  { %v1474_v9 = vpop.f32.mrb[2].mxu1 }
 0x23e   :  { %v1917_v10 = vadd.f32 %v1474_v9, %v1314_v61  ;;  %v354_v11 = vpop.f32.mrb[3].mxu1 }
 0x23f   :  { %v1919_v12 = vadd.f32 %v1314_v61, %v354_v11 }
 0x241   :  { %v436_v14 = vpop.f32.mrb[4].mxu1 }
 0x242   :  { %v440_v15 = vadd.f32 %v436_v14, %v325_v13  ;;  %v1485_v16 = vpop.f32.mrb[5].mxu1 }
 0x244   :  { %1675 = vtanh.f32 %v440_v15  ;;  %v1323_v18 = vmul.f32 -1.442695, %v440_v15 }
 0x246   :  { %1677 = vpow2.f32 %v1323_v18 }
 0x24e   :  { %v1676_v17 = vpop.eup %1675 }
 0x24f   :  { %450 = vrot.lane.b32.xlu0 %v1676_v17, %s1743_s4 }
 0x250   :  { %v1678_v19 = vpop.eup %1677 }
 0x251   :  { %v444_v20 = vadd.f32 1.0, %v1678_v19 }
 0x253   :  { %1679 = vrcp.f32 %v444_v20 }
 0x25d   :  { %v1680_v21 = vpop.eup %1679 }
 0x25e   :  { %v448_v24 = vmul.f32 0.0, %v1680_v21 }
 0x2c1   :  { %v451_v22 = vpop.permute.xlu0 %450 }
 0x2c2   :  { %v453_v23 = vmul.f32 %v1680_v21, %v451_v22 }
 0x2c4   :  { %455 = vrot.lane.b32.xlu1 %v453_v23, %s1744_s24 }
 0x336   :  { %v456_v25 = vpop.permute.xlu1 %455 }
 0x337   :  { %v458_v26 = vadd.f32 %v456_v25, %v448_v24 }
 0x339   :  { %1681 = vtanh.f32 %v458_v26 }
 0x343   :  { %v1682_v27 = vpop.eup %1681 }
 0x344   :  { %461 = vrot.lane.b32.xlu0 %v1682_v27, %s1743_s4 }
 0x3b6   :  { %v462_v28 = vpop.permute.xlu0 %461 }
 0x3b7   :  { %v464_v29 = vmul.f32 %v1680_v21, %v462_v28 }
 0x3b9   :  { %466 = vrot.lane.b32.xlu1 %v464_v29, %s1744_s24 }
 0x42b   :  { %v1925_v30 = vpop.permute.xlu1 %466 }
 0x42c   :  { %1495 = vmatmul.mubr.msk.f32.vlgmr.msra.gmra.mrb[12].mxu0 %vm233_vm9, %v1925_v30 }
 0x42d   :  { %1627 = vmatpush3.bf16.msra.mxu0 %v1870_v51  ;;  %1516 = vmatprep.mubr.msk.f32.mxu0 %vm1742_vm10, %v1740_v31 }
 0x42e   :  { %1628 = vmatprep.subr.bf16.mxu0 %v1741_v46 }
 0x431   :  { %1630 = vmatpush3.bf16.msra.mxu0 %v1882_v56 }
 0x432   :  { %1637 = vmatprep.subr.bf16.mxu0 %v1741_v46 }
 0x4ff   :  { %v536_v32 = vpop.f32.mrb[12].mxu0 }
 0x500   :  { %v540_v33 = vadd.f32 %v536_v32, %v330_v63  ;;  %v1496_v34 = vpop.f32.mrb[13].mxu0 }
 0x502   :  { %1683 = vtanh.f32 %v540_v33  ;;  %v1325_v36 = vmul.f32 -1.442695, %v540_v33 }
 0x504   :  { %1685 = vpow2.f32 %v1325_v36 }
 0x50c   :  { %v1684_v35 = vpop.eup %1683 }
 0x50d   :  { %550 = vrot.lane.b32.xlu0 %v1684_v35, %s1743_s4 }
 0x50e   :  { %v1686_v37 = vpop.eup %1685 }
 0x50f   :  { %v544_v38 = vadd.f32 1.0, %v1686_v37 }
 0x511   :  { %1687 = vrcp.f32 %v544_v38 }
 0x51b   :  { %v1688_v39 = vpop.eup %1687 }
 0x51c   :  { %v548_v42 = vmul.f32 %v1688_v39, %v458_v26 }
 0x57f   :  { %v551_v40 = vpop.permute.xlu0 %550 }
 0x580   :  { %v553_v41 = vmul.f32 %v1688_v39, %v551_v40 }
 0x582   :  { %555 = vrot.lane.b32.xlu1 %v553_v41, %s1744_s24 }
 0x5f4   :  { %v556_v43 = vpop.permute.xlu1 %555 }
 0x5f5   :  { %v558_v44 = vadd.f32 %v556_v43, %v548_v42 }
 0x5f7   :  { %1689 = vtanh.f32 %v558_v44 }
 0x601   :  { %v1690_v45 = vpop.eup %1689 }
 0x602   :  { %561 = vrot.lane.b32.xlu0 %v1690_v45, %s1743_s4 }
 0x674   :  { %v562_v47 = vpop.permute.xlu0 %561 }
 0x675   :  { %v564_v48 = vmul.f32 %v1688_v39, %v562_v47 }
 0x677   :  { %566 = vrot.lane.b32.xlu1 %v564_v48, %s1744_s24 }
 0x6e9   :  { %v1939_v49 = vpop.permute.xlu1 %566 }
 0x6ea   :  { %1506 = vmatmul.mubr.msk.f32.vlgmr.msra.gmra.mrb[6].mxu1 %vm233_vm9, %v1939_v49 }
 0x6eb   :  { %1633 = vmatpush3.bf16.msra.mxu1 %v1870_v51  ;;  %1527 = vmatprep.mubr.msk.f32.mxu1 %vm1742_vm10, %v1740_v31 }
 0x6ec   :  { %1634 = vmatprep.subr.bf16.mxu1 %v1741_v46 }
 0x6ef   :  { %1636 = vmatpush3.bf16.msra.mxu1 %v1882_v56 }
 0x6f0   :  { %1643 = vmatprep.subr.bf16.mxu1 %v1741_v46 }
 0x7bd   :  { %v636_v50 = vpop.f32.mrb[6].mxu1 }
 0x7be   :  { %v640_v52 = vadd.f32 %v636_v50, %v1911_v4  ;;  %v1507_v53 = vpop.f32.mrb[7].mxu1 }
 0x7c0   :  { %1691 = vtanh.f32 %v640_v52  ;;  %v1327_v55 = vmul.f32 -1.442695, %v640_v52 }
 0x7c2   :  { %1693 = vpow2.f32 %v1327_v55 }
 0x7ca   :  { %v1692_v54 = vpop.eup %1691 }
 0x7cb   :  { %650 = vrot.lane.b32.xlu0 %v1692_v54, %s1743_s4 }
 0x7cc   :  { %v1694_v57 = vpop.eup %1693 }
 0x7cd   :  { %v644_v58 = vadd.f32 1.0, %v1694_v57  ;;  %v1166_v57 = vld [vmem:[%s2072_s5 + $0x8] sm:$0xff] }
 0x7cf   :  { %1695 = vrcp.f32 %v644_v58 }
 0x7d9   :  { %v1696_v59 = vpop.eup %1695 }
 0x7da   :  { %v648_v62 = vmul.f32 %v1696_v59, %v558_v44 }
 0x83d   :  { %v651_v60 = vpop.permute.xlu0 %650 }
 0x83e   :  { %v653_v61 = vmul.f32 %v1696_v59, %v651_v60 }
 0x840   :  { %655 = vrot.lane.b32.xlu1 %v653_v61, %s1744_s24 }
 0x8b2   :  { %v656_v63 = vpop.permute.xlu1 %655 }
 0x8b3   :  { %v658_v0 = vadd.f32 %v656_v63, %v648_v62  ;;  %v1167_v62 = vld [vmem:[%s2072_s5 + $0x10] sm:$0xff]  ;;  %v1168_v63 = vld [vmem:[%s2072_s5 + $0x18] sm:$0xff] }
 0x8b5   :  { %1697 = vtanh.f32 %v658_v0 }
 0x8bf   :  { %v1698_v1 = vpop.eup %1697 }
 0x8c0   :  { %661 = vrot.lane.b32.xlu0 %v1698_v1, %s1743_s4 }
 0x932   :  { %v662_v3 = vpop.permute.xlu0 %661 }
 0x933   :  { %v664_v4 = vmul.f32 %v1696_v59, %v662_v3 }
 0x935   :  { %666 = vrot.lane.b32.xlu1 %v664_v4, %s1744_s24 }
 0x9a7   :  { %v1954_v5 = vpop.permute.xlu1 %666 }
 0x9a8   :  { %1517 = vmatmul.mubr.msk.f32.vlgmr.msra.gmra.mrb[14].mxu0 %vm233_vm9, %v1954_v5 }
 0x9a9   :  { %1639 = vmatpush3.bf16.msra.mxu0 %v1870_v51  ;;  %1538 = vmatprep.mubr.msk.f32.mxu0 %vm1742_vm10, %v1740_v31 }
 0x9aa   :  { %1640 = vmatprep.subr.bf16.mxu0 %v1741_v46 }
 0x9ad   :  { %1642 = vmatpush3.bf16.msra.mxu0 %v1882_v56 }
 0x9ae   :  { %1649 = vmatprep.subr.bf16.mxu0 %v1741_v46 }
 0xa7b   :  { %v736_v7 = vpop.f32.mrb[14].mxu0 }
 0xa7c   :  { %v740_v9 = vadd.f32 %v736_v7, %v1909_v2  ;;  %v1518_v11 = vpop.f32.mrb[15].mxu0 }
 0xa7e   :  { %1699 = vtanh.f32 %v740_v9  ;;  %v1329_v14 = vmul.f32 -1.442695, %v740_v9 }
 0xa80   :  { %1701 = vpow2.f32 %v1329_v14 }
 0xa88   :  { %v1700_v13 = vpop.eup %1699 }
 0xa89   :  { %750 = vrot.lane.b32.xlu0 %v1700_v13, %s1743_s4 }
 0xa8a   :  { %v1702_v15 = vpop.eup %1701 }
 0xa8b   :  { %v744_v16 = vadd.f32 1.0, %v1702_v15 }
 0xa8d   :  { %1703 = vrcp.f32 %v744_v16 }
 0xa97   :  { %v1704_v17 = vpop.eup %1703 }
 0xa98   :  { %v748_v20 = vmul.f32 %v1704_v17, %v658_v0  ;;  %v1659_v0 = vpack.c.bf16 %v1168_v63, %v1167_v62 }
 0xafb   :  { %v751_v18 = vpop.permute.xlu0 %750 }
 0xafc   :  { %v753_v19 = vmul.f32 %v1704_v17, %v751_v18 }
 0xafe   :  { %755 = vrot.lane.b32.xlu1 %v753_v19, %s1744_s24 }
 0xb70   :  { %v756_v21 = vpop.permute.xlu1 %755 }
 0xb71   :  { %v758_v22 = vadd.f32 %v756_v21, %v748_v20 }
 0xb73   :  { %1705 = vtanh.f32 %v758_v22 }
 0xb7d   :  { %v1706_v2 = vpop.eup %1705 }
 0xb7e   :  { %761 = vrot.lane.b32.xlu0 %v1706_v2, %s1743_s4 }
 0xbf0   :  { %v762_v23 = vpop.permute.xlu0 %761 }
 0xbf1   :  { %v764_v24 = vmul.f32 %v1704_v17, %v762_v23 }
 0xbf3   :  { %766 = vrot.lane.b32.xlu1 %v764_v24, %s1744_s24 }
 0xc65   :  { %v1969_v25 = vpop.permute.xlu1 %766 }
 0xc66   :  { %1528 = vmatmul.mubr.msk.f32.vlgmr.msra.gmra.mrb[8].mxu1 %vm233_vm9, %v1969_v25 }
 0xc67   :  { %1645 = vmatpush3.bf16.msra.mxu1 %v1870_v51  ;;  %1549 = vmatprep.mubr.msk.f32.mxu1 %vm1742_vm10, %v1740_v31 }
 0xc68   :  { %1646 = vmatprep.subr.bf16.mxu1 %v1741_v46 }
 0xc6b   :  { %1648 = vmatpush3.bf16.msra.mxu1 %v1882_v56 }
 0xd39   :  { %v836_v26 = vpop.f32.mrb[8].mxu1 }
 0xd3a   :  { %v840_v27 = vadd.f32 %v836_v26, %v1915_v8  ;;  %v1529_v28 = vpop.f32.mrb[9].mxu1 }
 0xd3c   :  { %1707 = vtanh.f32 %v840_v27  ;;  %v1331_v32 = vmul.f32 -1.442695, %v840_v27 }
 0xd3e   :  { %1709 = vpow2.f32 %v1331_v32 }
 0xd46   :  { %v1708_v29 = vpop.eup %1707 }
 0xd47   :  { %850 = vrot.lane.b32.xlu0 %v1708_v29, %s1743_s4 }
 0xd48   :  { %v1710_v33 = vpop.eup %1709 }
 0xd49   :  { %v844_v34 = vadd.f32 1.0, %v1710_v33 }
 0xd4b   :  { %1711 = vrcp.f32 %v844_v34 }
 0xd55   :  { %v1712_v35 = vpop.eup %1711 }
 0xd56   :  { %v848_v38 = vmul.f32 %v1712_v35, %v758_v22 }
 0xdb9   :  { %v851_v36 = vpop.permute.xlu0 %850 }
 0xdba   :  { %v853_v37 = vmul.f32 %v1712_v35, %v851_v36 }
 0xdbc   :  { %855 = vrot.lane.b32.xlu1 %v853_v37, %s1744_s24 }
 0xe2e   :  { %v856_v39 = vpop.permute.xlu1 %855 }
 0xe2f   :  { %v858_v40 = vadd.f32 %v856_v39, %v848_v38 }
 0xe31   :  { %1713 = vtanh.f32 %v858_v40 }
 0xe3b   :  { %v1714_v8 = vpop.eup %1713 }
 0xe3c   :  { %861 = vrot.lane.b32.xlu0 %v1714_v8, %s1743_s4 }
 0xeae   :  { %v862_v41 = vpop.permute.xlu0 %861 }
 0xeaf   :  { %v864_v42 = vmul.f32 %v1712_v35, %v862_v41 }
 0xeb1   :  { %866 = vrot.lane.b32.xlu1 %v864_v42, %s1744_s24 }
 0xf23   :  { %v867_v43 = vpop.permute.xlu1 %866 }
 0xf24   :  { %1539 = vmatmul.mubr.msk.f32.vlgmr.msra.gmra.mrb[16].mxu0 %vm233_vm9, %v867_v43 }
 0xf25   :  { %1651 = vmatpush3.bf16.msra.mxu0 %v1870_v51  ;;  %1560 = vmatprep.mubr.msk.f32.mxu0 %vm1742_vm10, %v1740_v31 }
 0xf26   :  { %1652 = vmatprep.subr.bf16.mxu0 %v1741_v46 }
 0xf29   :  { %1654 = vmatpush3.bf16.msra.mxu0 %v1882_v56 }
 0xff7   :  { %v936_v44 = vpop.f32.mrb[16].mxu0 }
 0xff8   :  { %v940_v45 = vadd.f32 %v936_v44, %v1913_v6  ;;  %v1540_v47 = vpop.f32.mrb[17].mxu0  ;;  %v1165_v6 = vld [vmem:[%s2072_s5] sm:$0xff] }
 0xff9   :  { %v1655_v58 = vpack.c.bf16 %v1166_v57, %v1165_v6 }
 0xffa   :  { %1715 = vtanh.f32 %v940_v45  ;;  %v1333_v50 = vmul.f32 -1.442695, %v940_v45 }
 0xffb   :  { %1656 = vmatprep.subr.bf16.mxu1 %v1655_v58 }
 0xffc   :  { %1717 = vpow2.f32 %v1333_v50 }
0x1004   :  { %v1716_v48 = vpop.eup %1715 }
0x1005   :  { %950 = vrot.lane.b32.xlu0 %v1716_v48, %s1743_s4 }
0x1006   :  { %v1718_v52 = vpop.eup %1717 }
0x1007   :  { %v944_v53 = vadd.f32 1.0, %v1718_v52 }
0x1009   :  { %1719 = vrcp.f32 %v944_v53 }
0x1013   :  { %v1720_v51 = vpop.eup %1719 }
0x1014   :  { %v948_v46 = vmul.f32 %v1720_v51, %v858_v40 }
0x1077   :  { %v951_v54 = vpop.permute.xlu0 %950 }
0x1078   :  { %v953_v31 = vmul.f32 %v1720_v51, %v951_v54 }
0x107a   :  { %955 = vrot.lane.b32.xlu1 %v953_v31, %s1744_s24 }
0x10ec   :  { %v956_v56 = vpop.permute.xlu1 %955 }
0x10ed   :  { %v958_v55 = vadd.f32 %v956_v56, %v948_v46 }
0x10ef   :  { %1721 = vtanh.f32 %v958_v55 }
0x10f9   :  { %v1722_v59 = vpop.eup %1721 }
0x10fa   :  { %961 = vrot.lane.b32.xlu0 %v1722_v59, %s1743_s4 }
0x116c   :  { %v962_v60 = vpop.permute.xlu0 %961 }
0x116d   :  { %v964_v61 = vmul.f32 %v1720_v51, %v962_v60 }
0x116f   :  { %966 = vrot.lane.b32.xlu1 %v964_v61, %s1744_s24 }
0x11e1   :  { %v967_v1 = vpop.permute.xlu1 %966 }
0x11e2   :  { %1550 = vmatmul.mubr.msk.f32.vlgmr.msra.gmra.mrb[10].mxu1 %vm233_vm9, %v967_v1 }
0x11e3   :  { %1658 = vmatpush3.bf16.msra.mxu1 %v1655_v58  ;;  %1571 = vmatprep.mubr.msk.f32.mxu1 %vm233_vm9, %v1925_v30  ;;  %v2021_v30 = vld [vmem:[%s2073_s6] ss:$0 sm:$0xff] }
0x11e4   :  { %1660 = vmatprep.subr.bf16.mxu1 %v1659_v0 }
0x11e7   :  { %1662 = vmatpush3.bf16.msra.mxu1 %v1659_v0 }
0x11ea   :  { %1572 = vmatmul.mubr.msk.f32.vlgmr.msra.gmra.mrb[12].mxu1 %vm233_vm9, %v1939_v49 }
0x11eb   :  { %1574 = vmatprep.mubr.msk.f32.mxu1 %vm233_vm9, %v1954_v5 }
0x11ee   :  { %1575 = vmatmul.mubr.msk.f32.gmra.mrb[14].mxu1 %vm233_vm9, %v1969_v25 }
0x11ef   :  { %1577 = vmatprep.mubr.msk.f32.mxu1 %vm233_vm9, %v867_v43 }
0x11f2   :  { %1578 = vmatmul.mubr.msk.f32.gmra.mrb[16].mxu1 %vm233_vm9, %v967_v1 }
0x12b5   :  { %v1036_v3 = vpop.f32.mrb[10].mxu1 }
0x12b6   :  { %v1040_v4 = vadd.f32 %v1036_v3, %v1919_v12  ;;  %v1551_v7 = vpop.f32.mrb[11].mxu1 }
0x12b8   :  { %1723 = vtanh.f32 %v1040_v4  ;;  %v1335_v21 = vmul.f32 -1.442695, %v1040_v4 }
0x12ba   :  { %1725 = vpow2.f32 %v1335_v21 }
0x12bd   :  { %v1573_v49 = vpop.f32.mrb[12].mxu1 }
0x12be   :  { %v1253_v5 = vadd.f32 %v1573_v49, %v2021_v30  ;;  %v1247_v9 = vpop.f32.mrb[13].mxu1 }
0x12bf   :  { %v1248_v11 = vadd.f32 %v2021_v30, %v1247_v9 }
0x12c0   :  { %1287 = vst [vmem:[%s2074_s7 + $0x8] sm:$0xff] %v1253_v5 }
0x12c1   :  { %1286 = vst [vmem:[%s2074_s7] sm:$0xff] %v1248_v11  ;;  %v1576_v12 = vpop.f32.mrb[14].mxu1 }
0x12c2   :  { %v1724_v13 = vpop.eup %1723  ;;  %v1263_v14 = vadd.f32 %v1576_v12, %v2021_v30  ;;  %v1257_v15 = vpop.f32.mrb[15].mxu1 }
0x12c3   :  { %v1258_v16 = vadd.f32 %v2021_v30, %v1257_v15  ;;  %1050 = vrot.lane.b32.xlu0 %v1724_v13, %s1743_s4 }
0x12c4   :  { %1289 = vst [vmem:[%s2074_s7 + $0x18] sm:$0xff] %v1263_v14  ;;  %v1726_v22 = vpop.eup %1725 }
0x12c5   :  { %1288 = vst [vmem:[%s2074_s7 + $0x10] sm:$0xff] %v1258_v16  ;;  %v1579_v17 = vpop.f32.mrb[16].mxu1  ;;  %v1044_v2 = vadd.f32 1.0, %v1726_v22 }
0x12c6   :  { %v1273_v18 = vadd.f32 %v1579_v17, %v2021_v30  ;;  %v1267_v19 = vpop.f32.mrb[17].mxu1 }
0x12c7   :  { %v1268_v20 = vadd.f32 %v2021_v30, %v1267_v19  ;;  %1727 = vrcp.f32 %v1044_v2 }
0x12c8   :  { %1291 = vst [vmem:[%s2074_s7 + $0x28] sm:$0xff] %v1273_v18 }
0x12c9   :  { %1290 = vst [vmem:[%s2074_s7 + $0x20] sm:$0xff] %v1268_v20 }
0x12d1   :  { %v1728_v23 = vpop.eup %1727 }
0x12d2   :  { %v1048_v26 = vmul.f32 %v1728_v23, %v958_v55 }
0x1335   :  { %v1051_v24 = vpop.permute.xlu0 %1050 }
0x1336   :  { %v1053_v25 = vmul.f32 %v1728_v23, %v1051_v24 }
0x1338   :  { %1055 = vrot.lane.b32.xlu1 %v1053_v25, %s1744_s24 }
0x13aa   :  { %v1056_v27 = vpop.permute.xlu1 %1055 }
0x13ab   :  { %v1058_v28 = vadd.f32 %v1056_v27, %v1048_v26 }
0x13ad   :  { %1729 = vtanh.f32 %v1058_v28 }
0x13b7   :  { %v1730_v29 = vpop.eup %1729 }
0x13b8   :  { %1061 = vrot.lane.b32.xlu0 %v1730_v29, %s1743_s4 }
0x142a   :  { %v1062_v32 = vpop.permute.xlu0 %1061 }
0x142b   :  { %v1064_v33 = vmul.f32 %v1728_v23, %v1062_v32 }
0x142d   :  { %1066 = vrot.lane.b32.xlu1 %v1064_v33, %s1744_s24 }
0x149f   :  { %v1067_v34 = vpop.permute.xlu1 %1066 }
0x14a0   :  { %1561 = vmatmul.mubr.msk.f32.vlgmr.msra.gmra.mrb[18].mxu0 %vm233_vm9, %v1067_v34  ;;  %1580 = vmatprep.mubr.msk.f32.mxu1 %vm233_vm9, %v1067_v34 }
0x1573   :  { %v1136_v35 = vpop.f32.mrb[18].mxu0 }
0x1574   :  { %v1140_v36 = vadd.f32 %v1136_v35, %v1917_v10  ;;  %v1562_v37 = vpop.f32.mrb[19].mxu0 }
0x1576   :  { %1731 = vtanh.f32 %v1140_v36  ;;  %v1337_v39 = vmul.f32 -1.442695, %v1140_v36 }
0x1578   :  { %1733 = vpow2.f32 %v1337_v39 }
0x1580   :  { %v1732_v38 = vpop.eup %1731 }
0x1581   :  { %1150 = vrot.lane.b32.xlu0 %v1732_v38, %s1743_s4 }
0x1582   :  { %v1734_v40 = vpop.eup %1733 }
0x1583   :  { %v1144_v8 = vadd.f32 1.0, %v1734_v40 }
0x1585   :  { %1735 = vrcp.f32 %v1144_v8 }
0x158f   :  { %v1736_v41 = vpop.eup %1735 }
0x1590   :  { %v1148_v44 = vmul.f32 %v1736_v41, %v1058_v28 }
0x15f3   :  { %v1151_v42 = vpop.permute.xlu0 %1150 }
0x15f4   :  { %v1153_v43 = vmul.f32 %v1736_v41, %v1151_v42 }
0x15f6   :  { %1155 = vrot.lane.b32.xlu1 %v1153_v43, %s1744_s24 }
0x1668   :  { %v1156_v45 = vpop.permute.xlu1 %1155 }
0x1669   :  { %v1158_v47 = vadd.f32 %v1156_v45, %v1148_v44 }
0x166b   :  { %1737 = vtanh.f32 %v1158_v47 }
0x1675   :  { %v1738_v10 = vpop.eup %1737 }
0x1676   :  { %1161 = vrot.lane.b32.xlu0 %v1738_v10, %s1743_s4 }
0x16e8   :  { %v1162_v48 = vpop.permute.xlu0 %1161 }
0x16e9   :  { %v1164_v50 = vmul.f32 %v1736_v41, %v1162_v48 }
0x16eb   :  { %1177 = vrot.lane.b32.xlu1 %v1164_v50, %s1744_s24 }
0x175d   :  { %v1178_v52 = vpop.permute.xlu1 %1177 }
0x175e   :  { %1581 = vmatmul.mubr.msk.f32.gmra.mrb[18].mxu1 %vm233_vm9, %v1178_v52 }
0x1831   :  { %v1582_v53 = vpop.f32.mrb[18].mxu1 }
0x1832   :  { %v1283_v51 = vadd.f32 %v1582_v53, %v2021_v30  ;;  %v1277_v54 = vpop.f32.mrb[19].mxu1 }
0x1833   :  { %v1278_v31 = vadd.f32 %v2021_v30, %v1277_v54 }
0x1834   :  { %1293 = vst [vmem:[%s2074_s7 + $0x38] sm:$0xff] %v1283_v51 }
0x1835   :  { %1292 = vst [vmem:[%s2074_s7 + $0x30] sm:$0xff] %v1278_v31 }

</bundles_post_ra>
